<compile_context>
chip_gen: v5e
topology: v5e:2x2
jax: 0.10.0
libtpu: 0.0.40
codegen_flags: <defaults>
</compile_context>

<pallas_src>
import jax
import jax.numpy as jnp
from jax.experimental import pallas as pl
from jax.experimental.pallas import tpu as pltpu

NBITS = 8  # stand-in for config.nbits

_TINY_INPUT_BYTES = 1 << 20   # <= 1 MiB of activations: single-block fast path
_MAX_L_TILE = 8192            # ~2 MiB input per block at TB=8, C=8 (f32)


def _round_up(x, m):
    return ((x + m - 1) // m) * m


def conv1x1_sigmoid_kernel(w_ref, b_ref, x_ref, o_ref):
    # w_ref: VMEM (1, C, 1) f32   b_ref: SMEM (1,) f32
    # x_ref: VMEM (TB, C, TL)     o_ref: VMEM (TB, TL)
    # Broadcast-multiply on the VPU, single cross-sublane reduce over the
    # channel axis, scalar bias add, sigmoid (EUP), dense store.
    y = jnp.sum(x_ref[...].astype(jnp.float32) * w_ref[...], axis=1)  # (TB, TL)
    y = y + b_ref[0]
    o_ref[...] = jax.nn.sigmoid(y).astype(o_ref.dtype)


def _select_tiles(B, C, L):
    """Return (TB, TL, grid)."""
    in_bytes = B * C * L * 4
    if in_bytes <= _TINY_INPUT_BYTES:
        # Tiny problem: one step, full-array blocks (legal block extents even
        # if not (8,128)-aligned because they equal the full array dims).
        return B, L, (1, 1)
    TB = min(B, 8)
    # Aim for ~8 steps along L (megacore balance on v7x when B <= 8) while
    # capping the tile at 8192 lanes; ragged last block is masked by Pallas.
    TL = min(_MAX_L_TILE, _round_up(pl.cdiv(L, 8), 128))
    TL = max(TL, 128)
    grid = (pl.cdiv(B, TB), pl.cdiv(L, TL))
    return TB, TL, grid


def fake_model_forward(x, weight, bias):
    """x: (B, C, L) f32; weight: (1, C, 1) f32 (PyTorch Conv1d layout); bias: (1,) f32."""
    B, C, L = x.shape
    w = weight.reshape(1, C, 1).astype(jnp.float32)   # tiny VMEM constant
    b = bias.reshape(1).astype(jnp.float32)           # scalar -> SMEM

    TB, TL, grid = _select_tiles(B, C, L)
    n_steps = grid[0] * grid[1]

    # Deepen the input pipeline only when there is something to pipeline.
    if n_steps >= 3:
        x_spec = pl.BlockSpec((TB, C, TL), lambda i, j: (i, 0, j),
                              pipeline_mode=pl.Buffered(3))
    else:
        x_spec = pl.BlockSpec((TB, C, TL), lambda i, j: (i, 0, j))

    cost = pl.CostEstimate(
        flops=2 * B * C * L + B * L,
        transcendentals=B * L,
        bytes_accessed=4 * (B * C * L + B * L) + 4 * (C + 1),
    )

    out2d = pl.pallas_call(
        conv1x1_sigmoid_kernel,
        out_shape=jax.ShapeDtypeStruct((B, L), jnp.float32),
        grid=grid,
        in_specs=[
            pl.BlockSpec((1, C, 1), lambda i, j: (0, 0, 0)),        # weight (VMEM)
            pl.BlockSpec(memory_space=pltpu.MemorySpace.SMEM),      # bias (scalar)
            x_spec,                                                 # activations
        ],
        out_specs=pl.BlockSpec((TB, TL), lambda i, j: (i, j)),      # lane-dense (B, L)
        compiler_params=pltpu.CompilerParams(
            dimension_semantics=("parallel", "parallel")),
        cost_estimate=cost,
    )(w, b, x)

    return out2d.reshape(B, 1, L)                                   # restore NCL layout


def reference_forward(x, weight, bias):
    # Pure-JAX reference: Conv1d with kernel_size=1 == einsum over channels.
    y = jnp.einsum("oc,bcl->bol", weight[:, :, 0], x) + bias[None, :, None]
    return jax.nn.sigmoid(y)


if __name__ == "__main__":
    key = jax.random.PRNGKey(0)
    kx, kw, kb, kx2 = jax.random.split(key, 4)

    C = NBITS
    # Deterministic Conv1d(NBITS, 1, 1) parameter shapes:
    #   weight: (out_ch=1, in_ch=NBITS, k=1), bias: (1,)
    bound = 1.0 / jnp.sqrt(jnp.float32(C))
    weight = jax.random.uniform(kw, (1, C, 1), jnp.float32, -bound, bound)
    bias = jax.random.uniform(kb, (1,), jnp.float32, -bound, bound)

    # --- Case 1: small shape (exercises the single-block fast path) ---
    B1, L1 = 2, 128
    x1 = jax.random.normal(kx, (B1, C, L1), dtype=jnp.float32)
    out1 = jax.block_until_ready(fake_model_forward(x1, weight, bias))
    ref1 = reference_forward(x1, weight, bias)
    assert out1.shape == (B1, 1, L1)
    assert jnp.allclose(out1, ref1, atol=1e-5, rtol=1e-5)

    # --- Case 2: ragged B and ragged L (exercises the tiled, buffered path) ---
    B2, L2 = 10, 4000   # -> TB=8 (ragged last B block), TL=512 (ragged last L block)
    x2 = jax.random.normal(kx2, (B2, C, L2), dtype=jnp.float32)
    out2 = jax.block_until_ready(fake_model_forward(x2, weight, bias))
    ref2 = reference_forward(x2, weight, bias)
    assert out2.shape == (B2, 1, L2)
    assert jnp.allclose(out2, ref2, atol=1e-5, rtol=1e-5)

    print("KERNEL_OK")
</pallas_src>

<mosaic_0001>
module attributes {stable_mosaic.version = 11 : i64} {
  func.func @conv1x1_sigmoid_kernel(%arg0: i32, %arg1: i32, %arg2: memref<1x8x1xf32, #tpu.memory_space<vmem>>, %arg3: memref<1xf32, #tpu.memory_space<smem>>, %arg4: memref<2x8x128xf32, #tpu.memory_space<vmem>>, %arg5: memref<2x128xf32, #tpu.memory_space<vmem>>) attributes {dimension_semantics = [#tpu.dimension_semantics<parallel>, #tpu.dimension_semantics<parallel>], iteration_bounds = array<i64: 1, 1>, scalar_prefetch = 0 : i64, scratch_operands = 0 : i64, tpu.core_type = #tpu.core_type<tc>, window_params = [{pipeline_mode = #tpu.pipeline_mode<synchronous>, transform_indices = @transform_0, window_bounds = array<i64: 1, 8, 1>}, {transform_indices = @transform_1, window_bounds = array<i64: 1>}, {transform_indices = @transform_2, window_bounds = array<i64: 2, 8, 128>}, {transform_indices = @transform_3, window_bounds = array<i64: 2, 128>}]} {
    %c0 = arith.constant 0 : index
    %c0_0 = arith.constant 0 : index
    %c0_1 = arith.constant 0 : index
    %0 = vector.load %arg4[%c0, %c0_0, %c0_1] : memref<2x8x128xf32, #tpu.memory_space<vmem>>, vector<2x8x128xf32>
    %c0_2 = arith.constant 0 : index
    %c0_3 = arith.constant 0 : index
    %c0_4 = arith.constant 0 : index
    %1 = vector.load %arg2[%c0_2, %c0_3, %c0_4] : memref<1x8x1xf32, #tpu.memory_space<vmem>>, vector<1x8x1xf32>
    %2 = vector.broadcast %1 : vector<1x8x1xf32> to vector<2x8x128xf32>
    %3 = arith.mulf %0, %2 : vector<2x8x128xf32>
    %cst = arith.constant dense<0.000000e+00> : vector<2x128xf32>
    %4 = vector.multi_reduction <add>, %3, %cst [1] : vector<2x8x128xf32> to vector<2x128xf32>
    %c0_5 = arith.constant 0 : index
    %5 = memref.load %arg3[%c0_5] : memref<1xf32, #tpu.memory_space<smem>>
    %6 = vector.broadcast %5 : f32 to vector<2x128xf32>
    %7 = arith.addf %4, %6 : vector<2x128xf32>
    %8 = arith.negf %7 : vector<2x128xf32>
    %9 = math.exp %8 : vector<2x128xf32>
    %cst_6 = arith.constant 1.000000e+00 : f32
    %10 = vector.broadcast %cst_6 : f32 to vector<2x128xf32>
    %11 = arith.addf %10, %9 : vector<2x128xf32>
    %12 = arith.divf %10, %11 : vector<2x128xf32>
    %c0_7 = arith.constant 0 : index
    %c0_8 = arith.constant 0 : index
    %13 = vector.load %arg5[%c0_7, %c0_8] : memref<2x128xf32, #tpu.memory_space<vmem>>, vector<2x128xf32>
    tpu.vector_store %arg5[%c0_7, %c0_8], %12 {strides = array<i32>} : memref<2x128xf32, #tpu.memory_space<vmem>>, vector<2x128xf32>,
    return
  }
  func.func @transform_0(%arg0: i32, %arg1: i32) -> (i32, i32, i32) {
    %c0_i32 = arith.constant 0 : i32
    %c0_i32_0 = arith.constant 0 : i32
    %c0_i32_1 = arith.constant 0 : i32
    %c0_i32_2 = arith.constant 0 : i32
    return %c0_i32, %c0_i32_0, %c0_i32_1 : i32, i32, i32
  }
  func.func @transform_1(%arg0: i32, %arg1: i32) -> i32 {
    %c0_i32 = arith.constant 0 : i32
    %c0_i32_0 = arith.constant 0 : i32
    return %c0_i32 : i32
  }
  func.func @transform_2(%arg0: i32, %arg1: i32) -> (i32, i32, i32) {
    %c0_i32 = arith.constant 0 : i32
    %c0_i32_0 = arith.constant 0 : i32
    return %arg0, %c0_i32, %arg1 : i32, i32, i32
  }
  func.func @transform_3(%arg0: i32, %arg1: i32) -> (i32, i32) {
    %c0_i32 = arith.constant 0 : i32
    return %arg0, %arg1 : i32, i32
  }
}

</mosaic_0001>

<bundles_post_ra>
// kernel: tpu_custom_call.1
= control target key start
LH: loop header
LB: loop body
LE: loop exit
PB: predicated region body
PF: predicated region fallthrough
CT: control target
= control target key end

     0   :  { %9 = vsyncpa [#allocation4], 0  ;;  %s224_s0 = inlined_call_operand.vmem [shape: f32[1,8,1], index: 0, kind: input, shape index: {}]   ;;  %s225_s1 = inlined_call_operand.<no memory space> [shape: f32[1], index: 1, kind: input, shape index: {}]   ;;  %s226_s2 = inlined_call_operand.hbm [shape: f32[2,8,128], index: 2, kind: input, shape index: {}]   ;;  %s227_s3 = inlined_call_operand.hbm [shape: f32[2,128], index: 3, kind: output, shape index: {}]  }
   0x1   :  { %10 = vsyncpa [#allocation5], 0  ;;  %s19_s14 = sshll.u32 %s226_s2, 4  ;;  %s187_s15 = smov [#allocation3]   ;;  %s20_s14 = int_to_ptr.hbm [resolvable:$true] %s19_s14 }
   0x2   :  { %s21_s16 = sshll.u32 %s187_s15, 4  ;;  %s188_s17 = smov 128   ;;  %s22_s16 = int_to_ptr.vmem [resolvable:$true] %s21_s16 }
   0x3   :  { %s189_s18 = smov 8  }
   0x4   :  { %27 = dma.hbm_to_vmem [thread:$0]  %s20_s14, 256, %s22_s16, [#allocation4], %s188_s17, %s188_s17, %s189_s18  }
   0x5   :  { %183 = dma.done.wait [#allocation4], 256  }
   0x6   :  { %184 = vsyncadd [#allocation4], 4294967040  ;;  %v190_v0 = vmov 0   ;;  %v34_v1 = vld [vmem:[%s224_s0] sm:$0xff]  ;;  %v33_v3 = vld [vmem:[#allocation3 + $0x8] sm:$0xff]  ;;  %v55_v17 = vstv %s225_s1  ;;  %s191_s0 = smov [#allocation6]  }
   0x7   :  { %126 = vset.pattern.permute.xlu0 %v190_v0  ;;  %v32_v2 = vld [vmem:[#allocation3] sm:$0xff]  ;;  %s107_s1 = sshll.u32 %s191_s0, 4  ;;  %s109_s24 = sshll.u32 %s227_s3, 4  ;;  %vm98_vm7 = vcmask 1041409   ;;  %s108_s1 = int_to_ptr.vmem [resolvable:$true] %s107_s1  ;;  %s110_s24 = int_to_ptr.hbm [resolvable:$true] %s109_s24 }
   0x8   :  { %37 = vperm.xlu0 %126, %v34_v1  }
  0x7a   :  { %v38_v4 = vpop.permute.xlu0 %37 }
  0x7b   :  { %v40_v5 = vmul.f32 %v38_v4, %v32_v2  ;;  %v41_v6 = vmul.f32 %v38_v4, %v33_v3 }
  0x7d   :  { %v42_v7 = vrot.slane %v40_v5, 4  ;;  %v48_v8 = vrot.slane %v41_v6, 4 }
  0x7f   :  { %v43_v9 = vadd.f32 %v42_v7, %v40_v5  ;;  %v49_v10 = vadd.f32 %v48_v8, %v41_v6 }
  0x81   :  { %v44_v11 = vrot.slane %v43_v9, 2  ;;  %v50_v12 = vrot.slane %v49_v10, 2 }
  0x83   :  { %v45_v13 = vadd.f32 %v44_v11, %v43_v9  ;;  %v51_v14 = vadd.f32 %v50_v12, %v49_v10 }
  0x85   :  { %v46_v15 = vrot.slane %v45_v13, 1  ;;  %v52_v16 = vrot.slane %v51_v14, 1 }
  0x87   :  { %v47_v18 = vadd.f32 %v46_v15, %v45_v13  ;;  %v53_v19 = vadd.f32 %v52_v16, %v51_v14 }
  0x89   :  { %v56_v20 = vadd.f32 %v55_v17, %v47_v18  ;;  %v57_v21 = vadd.f32 %v55_v17, %v53_v19 }
  0x8b   :  { %v119_v22 = vmul.f32 -1.442695, %v56_v20  ;;  %v120_v23 = vmul.f32 -1.442695, %v57_v21 }
  0x8d   :  { %127 = vpow2.f32 %v119_v22 }
  0x8e   :  { %129 = vpow2.f32 %v120_v23 }
  0x93   :  { %v128_v24 = vpop.eup %127 }
  0x94   :  { %v130_v25 = vpop.eup %129  ;;  %v64_v26 = vadd.f32 1.0, %v128_v24 }
  0x95   :  { %v65_v27 = vadd.f32 1.0, %v130_v25 }
  0x96   :  { %131 = vrcp.f32 %v64_v26  ;;  %v77_v33 = vand.u32 2147483648, %v64_v26  ;;  %v75_v36 = vand.u32 2147483647, %v64_v26  ;;  %vm71_vm2 = vweird.f32 %v64_v26 }
  0x97   :  { %133 = vrcp.f32 %v65_v27  ;;  %v92_v37 = vand.u32 2147483648, %v65_v27  ;;  %v90_v39 = vand.u32 2147483647, %v65_v27  ;;  %vm86_vm4 = vweird.f32 %v65_v27 }
  0x98   :  { %v78_v41 = vor.u32 1.1754944e-38, %v77_v33  ;;  %vm76_vm5 = vcmp.eq.f32.partialorder %v75_v36, 8.507059e+37 }
  0x99   :  { %v93_v44 = vor.u32 1.1754944e-38, %v92_v37  ;;  %vm91_vm8 = vcmp.eq.f32.partialorder %v90_v39, 8.507059e+37 }
  0x9c   :  { %v132_v28 = vpop.eup %131 }
  0x9d   :  { %v134_v29 = vpop.eup %133  ;;  %v67_v30 = vmul.f32 %v132_v28, %v64_v26  ;;  %vm72_vm0 = vweird.f32 %v132_v28 }
  0x9e   :  { %v82_v31 = vmul.f32 %v134_v29, %v65_v27  ;;  %vm87_vm1 = vweird.f32 %v134_v29  ;;  %vm73_vm3 = vmor %vm71_vm2, %vm72_vm0 }
  0x9f   :  { %v68_v32 = vsub.f32 1.0, %v67_v30  ;;  %vm88_vm6 = vmor %vm86_vm4, %vm87_vm1 }
  0xa0   :  { %v83_v34 = vsub.f32 1.0, %v82_v31 }
  0xa1   :  { %v69_v35 = vmul.f32 %v132_v28, %v68_v32 }
  0xa2   :  { %v84_v38 = vmul.f32 %v134_v29, %v83_v34 }
  0xa3   :  { %v70_v40 = vadd.f32 %v132_v28, %v69_v35 }
  0xa4   :  { %v85_v42 = vadd.f32 %v134_v29, %v84_v38 }
  0xa5   :  { %v74_v43 = vsel %vm73_vm3, %v132_v28, %v70_v40 }
  0xa6   :  { %v79_v45 = vsel %vm76_vm5, %v78_v41, %v74_v43  ;;  %v89_v46 = vsel %vm88_vm6, %v134_v29, %v85_v42 }
  0xa7   :  { %v94_v47 = vsel %vm91_vm8, %v93_v44, %v89_v46 }
  0xa8   :  { %v99_v48 = vsel %vm98_vm7, %v94_v47, %v79_v45 }
  0xa9   :  { %101 = vst [vmem:[#allocation6] sm:$0x3] %v99_v48 }
  0xaa   :  { %112 = dma.vmem_to_hbm [thread:$0]  %s108_s1, 32, %s110_s24, [#allocation5]  }
  0xab   :  { %185 = dma.done.wait [#allocation5], 32  }
  0xac   :  { %186 = vsyncadd [#allocation5], 4294967264 }
  0xad   :  { %117 = vsyncpa [#allocation4], 1 }
  0xae   :  { %118 = vsyncpa [#allocation5], 1 }

</bundles_post_ra>
